<compile_context>
chip_gen: v6e
topology: v6e:2x2x1
jax: 0.10.0
libtpu: 0.0.40
codegen_flags: <defaults>
</compile_context>

<pallas_src>
import functools

import jax
import jax.numpy as jnp
from jax import lax
from jax.experimental import pallas as pl
from jax.experimental.pallas import tpu as pltpu


_OUT_SUB = 8     # sublane-aligned per-tile partial-sum block
_OUT_LANE = 128  # lane-aligned (unmasked vst) per-tile partial-sum block


def _round_up(x, mult):
    return (x + mult - 1) // mult * mult


def _vmem_capacity_bytes():
    try:
        info = pltpu.get_tpu_info()
        cap = int(getattr(info, "vmem_capacity_bytes", 0) or 0)
        if cap > 0:
            return cap
    except Exception:
        pass
    return 64 * 1024 * 1024          # conservative fallback (v7x per-core VMEM)


def _device_kind():
    try:
        return jax.devices()[0].device_kind.lower()
    except Exception:
        return ""


def _pick_tile_m(m, two_m, d_pad, t_pad, budget_bytes, max_tm):
    """Largest row tile TM (divisor of M, <= max_tm) whose per-step temporaries
    fit the remaining VMEM budget."""
    cands = [c for c in (256, 128, 64, 32, 16, 8) if c <= max_tm and m % c == 0]
    if not cands:
        cands = [m]
    for tm in cands:
        temps = (10 * tm * two_m      # (TM, 2M) f32/i32 slabs live at peak
                 + 6 * tm * m         # (TM, M) quadrant temps
                 + tm * (d_pad + t_pad)) * 4
        if temps <= budget_bytes:
            return tm
    return cands[-1]


def _shift_left(x):
    """y[:, j] = x[:, j + 1] (value wrapped into the last column is masked out
    by every caller).  Uses an XLU lane rotation when lane-aligned; otherwise a
    slice+concat fallback (small shapes only)."""
    n = x.shape[-1]
    if n % 128 == 0:
        return pltpu.roll(x, shift=n - 1, axis=-1)
    return jnp.concatenate([x[:, 1:], x[:, :1]], axis=-1)


def _softclt_kernel(feat_ref, series_ref, ssq_row_ref, loss_ref, msl_ref, *,
                    alpha, tau, tile_m, m, two_m, m_row_tiles, matmul_bf16):
    i = pl.program_id(0)
    row0 = pl.multiple_of(i * tile_m, tile_m)       # first global row of this tile

    # ---- feature similarity: (TM, 2M) tile of F @ F^T on the MXU -------------
    f_all = feat_ref[...]                           # (2M, Dp) resident slab
    f_tile = feat_ref[pl.ds(row0, tile_m), :]       # (TM, Dp)
    if matmul_bf16:
        f_all = f_all.astype(jnp.bfloat16)
        f_tile = f_tile.astype(jnp.bfloat16)
    sim = lax.dot_general(f_tile, f_all, (((1,), (1,)), ((), ())),
                          preferred_element_type=jnp.float32)          # (TM, 2M)

    # ---- tril(-1)[:, :-1] + triu(-1)[:, 1:] masks at lane-aligned width 2M ----
    col = lax.broadcasted_iota(jnp.int32, (tile_m, two_m), 1)
    row = row0 + lax.broadcasted_iota(jnp.int32, (tile_m, two_m), 0)    # global rows
    valid = col < (two_m - 1)                       # last column is padding only
    keep_tril = jnp.logical_and(col < row, valid)
    keep_triu = jnp.logical_and(col >= row - 2, valid)

    sim_shift = _shift_left(sim)
    logits_pre = (jnp.where(keep_tril, sim, 0.0)
                  + jnp.where(keep_triu, sim_shift, 0.0))               # (TM, 2M)
    logits_msk = jnp.where(valid, logits_pre, -jnp.inf)
    mx = jnp.max(logits_msk, axis=-1, keepdims=True)                    # (TM, 1)
    denom = jnp.sum(jnp.exp(logits_msk - mx), axis=-1, keepdims=True)   # (TM, 1)

    # ---- soft labels: only the (TM, M) quadrant; repeat((2, 2)) realized by
    #      row-index mod M + half-folding of the weights below ----------------
    srow0 = pl.multiple_of((i % m_row_tiles) * tile_m, tile_m)
    s_tile = series_ref[pl.ds(srow0, tile_m), :]                        # (TM, Tp)
    ssq_tile = jnp.sum(s_tile * s_tile, axis=-1, keepdims=True)         # (TM, 1)
    ssq_row = ssq_row_ref[...]                                          # (1, M) precomputed
    s_all = series_ref[...]                                             # (M, Tp)
    if matmul_bf16:
        s_all = s_all.astype(jnp.bfloat16)
        s_tile = s_tile.astype(jnp.bfloat16)
    sdot = lax.dot_general(s_tile, s_all, (((1,), (1,)), ((), ())),
                           preferred_element_type=jnp.float32)          # (TM, M)
    dist = ssq_tile + ssq_row - 2.0 * sdot
    sl_half = (2.0 * alpha) * jax.nn.sigmoid(-tau * dist)               # (TM, M)
    sl_shift = _shift_left(sl_half)                                     # (TM, M)

    # ---- fused reductions: loss = sum(-log_softmax * soft_label_no_diag) ------
    # -log_softmax == (log(denom) + mx) - logits_pre on valid columns; the
    # duplicated label halves are folded so only (TM, M) products are formed.
    a = (jnp.log(denom) + mx) - logits_pre                              # (TM, 2M)
    a_tril = jnp.where(keep_tril, a, 0.0)
    a_triu = jnp.where(keep_triu, a, 0.0)
    loss_part = (jnp.sum((a_tril[:, :m] + a_tril[:, m:]) * sl_half)
                 + jnp.sum((a_triu[:, :m] + a_triu[:, m:]) * sl_shift))
    msl_part = 2.0 * jnp.sum(sl_half)    # sum of this row tile's (TM, 2M) labels

    loss_ref[...] = jnp.full((_OUT_SUB, _OUT_LANE), loss_part, dtype=loss_ref.dtype)
    msl_ref[...] = jnp.full((_OUT_SUB, _OUT_LANE), msl_part, dtype=msl_ref.dtype)


def softclt_loss(original_feature, augmented_feature, original_series, augmented_series,
                 *, alpha=0.5, tau=1.0, normalize=False, matmul_bf16=False):
    """Soft branch (hard=False) of SoftCLT_Loss.forward -> (loss, mean_soft_label)."""
    # TODO(synk): hard=True branch (logits[i, B+i-1] gather) not implemented here.
    b, t, n = original_series.shape
    B, N, D = original_feature.shape
    del augmented_series            # reshaped but never used by the torch soft branch

    m = B * N
    two_m = 2 * m
    if m % 8 != 0:
        # TODO(synk): pad M up to a multiple of 8 and mask instead of raising.
        raise ValueError(f"B*N = {m} must be a multiple of 8 (sublane alignment).")

    # ---- glue reshapes / concat / hoisted normalization in plain JAX ---------
    allf = jnp.concatenate(
        [original_feature.reshape(-1, D), augmented_feature.reshape(-1, D)],
        axis=0).astype(jnp.float32)                                     # (2M, D)
    if normalize:
        # F.normalize: x / max(||x||, 1e-12), done ONCE here (not per grid step).
        allf = allf * lax.rsqrt(
            jnp.maximum(jnp.sum(allf * allf, axis=-1, keepdims=True), 1e-24))
    series = jnp.transpose(original_series, (0, 2, 1)).reshape(-1, t)
    series = series.astype(jnp.float32)                                 # (M, T)
    ssq_row = jnp.sum(series * series, axis=-1)[None, :]                # (1, M)

    # zero-pad the contraction (lane) dims to multiples of 128
    d_pad = _round_up(D, 128)
    t_pad = _round_up(t, 128)
    if d_pad != D:
        allf = jnp.pad(allf, ((0, 0), (0, d_pad - D)))
    if t_pad != t:
        series = jnp.pad(series, ((0, 0), (0, t_pad - t)))

    # ---- generation-aware sizing ----------------------------------------------
    vmem_cap = _vmem_capacity_bytes()
    vmem_limit = min(max(int(0.80 * vmem_cap), 32 * 1024 * 1024), vmem_cap)
    kind = _device_kind()
    max_tm = 128 if ("v5 lite" in kind or "v5e" in kind) else 256   # v5e MXU is 128x128

    slab_bytes = (two_m * d_pad + m * t_pad + m) * 4       # resident inputs (one copy)
    out_bytes = 2 * 2 * _OUT_SUB * _OUT_LANE * 4            # double-buffered partials
    budget = vmem_limit - slab_bytes - out_bytes - (2 << 20)
    min_step = (10 * 8 * two_m + 6 * 8 * m + 8 * (d_pad + t_pad)) * 4
    if budget < min_step:
        # TODO(synk): column-tiled / online-softmax fallback when the resident
        # slabs exceed v7x-sized VMEM; fail loudly rather than mis-tile.
        raise ValueError(
            f"SoftCLT resident slabs (~{slab_bytes >> 20} MiB) do not fit the "
            f"{vmem_limit >> 20} MiB VMEM budget on this TPU ({kind or 'unknown'}).")

    tile_m = _pick_tile_m(m, two_m, d_pad, t_pad, budget, max_tm)
    num_tiles = two_m // tile_m
    m_row_tiles = m // tile_m

    kernel = functools.partial(
        _softclt_kernel, alpha=float(alpha), tau=float(tau),
        tile_m=tile_m, m=m, two_m=two_m, m_row_tiles=m_row_tiles,
        matmul_bf16=bool(matmul_bf16))

    out_shape = (jax.ShapeDtypeStruct((_OUT_SUB, _OUT_LANE * num_tiles), jnp.float32),
                 jax.ShapeDtypeStruct((_OUT_SUB, _OUT_LANE * num_tiles), jnp.float32))
    out_specs = (pl.BlockSpec((_OUT_SUB, _OUT_LANE), lambda i: (0, i)),
                 pl.BlockSpec((_OUT_SUB, _OUT_LANE), lambda i: (0, i)))
    cparams = pltpu.CompilerParams(
        dimension_semantics=("parallel",),
        vmem_limit_bytes=int(vmem_limit))

    def _call(resident_vmem):
        if resident_vmem:
            # Whole-array VMEM operands: one resident copy, no double-buffering.
            in_specs = [pl.BlockSpec(memory_space=pltpu.MemorySpace.VMEM)] * 3
        else:
            # Blocked fallback (constant index maps; runtime may double-buffer).
            in_specs = [pl.BlockSpec((two_m, d_pad), lambda i: (0, 0)),
                        pl.BlockSpec((m, t_pad), lambda i: (0, 0)),
                        pl.BlockSpec((1, m), lambda i: (0, 0))]
        return pl.pallas_call(
            kernel, grid=(num_tiles,), out_shape=out_shape,
            in_specs=in_specs, out_specs=out_specs,
            compiler_params=cparams,
        )(allf, series, ssq_row)

    try:
        loss_out, msl_out = _call(True)
    except Exception:
        loss_out, msl_out = _call(False)   # robustness across jax/TPU versions

    loss_parts = loss_out[0].reshape(num_tiles, _OUT_LANE)[:, 0]
    msl_parts = msl_out[0].reshape(num_tiles, _OUT_LANE)[:, 0]
    loss = jnp.sum(loss_parts) / (two_m * (two_m - 1))
    msl = jnp.sum(msl_parts) / (two_m * two_m)
    return loss, msl


def softclt_ref(original_feature, augmented_feature, original_series, augmented_series,
                *, alpha=0.5, tau=1.0, normalize=False):
    """Pure-JAX mirror of the PyTorch forward (soft branch), for verification."""
    b, t, n = original_series.shape
    B, N, D = original_feature.shape
    of = original_feature.reshape(-1, D)
    af = augmented_feature.reshape(-1, D)
    allf = jnp.concatenate([of, af], axis=0).astype(jnp.float32)
    if normalize:
        allf = allf / jnp.maximum(jnp.linalg.norm(allf, axis=-1, keepdims=True), 1e-12)
    sim = allf @ allf.T
    logits = jnp.tril(sim, k=-1)[:, :-1] + jnp.triu(sim, k=-1)[:, 1:]
    logits = -jax.nn.log_softmax(logits, axis=-1)

    osr = jnp.transpose(original_series, (0, 2, 1)).reshape(-1, t).astype(jnp.float32)
    ssq = jnp.sum(osr ** 2, axis=-1)
    dot = osr @ osr.T
    mse = ssq[:, None] + ssq[None, :] - 2.0 * dot
    pd = jnp.tile(mse, (2, 2))
    sl = 2.0 * alpha * jax.nn.sigmoid(-tau * pd)
    sl_nd = jnp.tril(sl, k=-1)[:, :-1] + jnp.triu(sl, k=-1)[:, 1:]
    loss = jnp.mean(logits * sl_nd)
    msl = jnp.mean(sl)
    return loss, msl


if __name__ == "__main__":
    B, N, D, T = 2, 4, 32, 8
    alpha, tau = 0.5, 1.0

    key = jax.random.PRNGKey(0)
    k1, k2, k3, k4 = jax.random.split(key, 4)
    original_feature = jax.random.normal(k1, (B, N, D), dtype=jnp.float32)
    augmented_feature = jax.random.normal(k2, (B, N, D), dtype=jnp.float32)
    original_series = jax.random.normal(k3, (B, T, N), dtype=jnp.float32)
    augmented_series = jax.random.normal(k4, (B, T, N), dtype=jnp.float32)

    for norm in (False, True):
        loss, msl = softclt_loss(original_feature, augmented_feature,
                                 original_series, augmented_series,
                                 alpha=alpha, tau=tau, normalize=norm)
        jax.block_until_ready((loss, msl))

        loss_r, msl_r = softclt_ref(original_feature, augmented_feature,
                                    original_series, augmented_series,
                                    alpha=alpha, tau=tau, normalize=norm)
        assert jnp.allclose(loss, loss_r, rtol=1e-4, atol=1e-5), (norm, loss, loss_r)
        assert jnp.allclose(msl, msl_r, rtol=1e-4, atol=1e-5), (norm, msl, msl_r)

    print("KERNEL_OK")
</pallas_src>

<mosaic_0001>
module attributes {stable_mosaic.version = 11 : i64} {
  func.func @_softclt_kernel(%arg0: i32, %arg1: memref<16x128xf32, #tpu.memory_space<vmem>>, %arg2: memref<8x128xf32, #tpu.memory_space<vmem>>, %arg3: memref<1x8xf32, #tpu.memory_space<vmem>>, %arg4: memref<8x128xf32, #tpu.memory_space<vmem>>, %arg5: memref<8x128xf32, #tpu.memory_space<vmem>>) attributes {dimension_semantics = [#tpu.dimension_semantics<parallel>], iteration_bounds = array<i64: 2>, scalar_prefetch = 0 : i64, scratch_operands = 0 : i64, tpu.core_type = #tpu.core_type<tc>, window_params = [{pipeline_mode = #tpu.pipeline_mode<synchronous>, transform_indices = @transform_0, window_bounds = array<i64: 16, 128>}, {pipeline_mode = #tpu.pipeline_mode<synchronous>, transform_indices = @transform_1, window_bounds = array<i64: 8, 128>}, {pipeline_mode = #tpu.pipeline_mode<synchronous>, transform_indices = @transform_2, window_bounds = array<i64: 1, 8>}, {transform_indices = @transform_3, window_bounds = array<i64: 8, 128>}, {transform_indices = @transform_4, window_bounds = array<i64: 8, 128>}]} {
    %c8_i32 = arith.constant 8 : i32
    %0 = arith.muli %arg0, %c8_i32 : i32
    %1 = tpu.assume_multiple %0, 8 : i32
    %c0 = arith.constant 0 : index
    %c0_0 = arith.constant 0 : index
    %2 = vector.load %arg1[%c0, %c0_0] : memref<16x128xf32, #tpu.memory_space<vmem>>, vector<16x128xf32>
    %3 = arith.index_cast %1 : i32 to index
    %c0_1 = arith.constant 0 : index
    %4 = vector.load %arg1[%3, %c0_1] : memref<16x128xf32, #tpu.memory_space<vmem>>, vector<8x128xf32>
    %cst = arith.constant dense<0.000000e+00> : vector<8x16xf32>
    %5 = tpu.matmul %4, %2, %cst {dimension_numbers = #tpu.dot_dimension_numbers<[1], [1], [0], [0], [0, 0, 1, 0], [], []>} : vector<8x128xf32>, vector<16x128xf32>, vector<8x16xf32> -> vector<8x16xf32>
    %6 = tpu.iota {dimensions = array<i32: 1>} : vector<8x16xi32>
    %7 = tpu.iota {dimensions = array<i32: 0>} : vector<8x16xi32>
    %8 = vector.broadcast %1 : i32 to vector<8x16xi32>
    %9 = arith.addi %8, %7 : vector<8x16xi32>
    %c15_i32 = arith.constant 15 : i32
    %10 = vector.broadcast %c15_i32 : i32 to vector<8x16xi32>
    %11 = arith.cmpi slt, %6, %10 : vector<8x16xi32>
    %12 = arith.cmpi slt, %6, %9 : vector<8x16xi32>
    %13 = arith.andi %12, %11 : vector<8x16xi1>
    %c2_i32 = arith.constant 2 : i32
    %14 = vector.broadcast %c2_i32 : i32 to vector<8x16xi32>
    %15 = arith.subi %9, %14 : vector<8x16xi32>
    %16 = arith.cmpi sge, %6, %15 : vector<8x16xi32>
    %17 = arith.andi %16, %11 : vector<8x16xi1>
    %18 = vector.extract_strided_slice %5 {offsets = [0, 1], sizes = [8, 15], strides = [1, 1]} : vector<8x16xf32> to vector<8x15xf32>
    %19 = vector.extract_strided_slice %5 {offsets = [0, 0], sizes = [8, 1], strides = [1, 1]} : vector<8x16xf32> to vector<8x1xf32>
    %20 = tpu.concatenate %18, %19 in 1 : vector<8x15xf32>, vector<8x1xf32> -> vector<8x16xf32>
    %cst_2 = arith.constant 0.000000e+00 : f32
    %21 = vector.broadcast %cst_2 : f32 to vector<8x16xf32>
    %22 = arith.select %13, %5, %21 : vector<8x16xi1>, vector<8x16xf32>
    %cst_3 = arith.constant 0.000000e+00 : f32
    %23 = vector.broadcast %cst_3 : f32 to vector<8x16xf32>
    %24 = arith.select %17, %20, %23 : vector<8x16xi1>, vector<8x16xf32>
    %25 = arith.addf %22, %24 : vector<8x16xf32>
    %cst_4 = arith.constant 0xFF800000 : f32
    %26 = vector.broadcast %cst_4 : f32 to vector<8x16xf32>
    %27 = arith.select %11, %25, %26 : vector<8x16xi1>, vector<8x16xf32>
    %cst_5 = arith.constant dense<0xFF800000> : vector<8xf32>
    %28 = vector.multi_reduction <maximumf>, %27, %cst_5 [1] : vector<8x16xf32> to vector<8xf32>
    %29 = vector.shape_cast %28 : vector<8xf32> to vector<8x1xf32>
    %30 = vector.broadcast %29 : vector<8x1xf32> to vector<8x16xf32>
    %31 = arith.subf %27, %30 : vector<8x16xf32>
    %32 = math.exp %31 : vector<8x16xf32>
    %cst_6 = arith.constant dense<0.000000e+00> : vector<8xf32>
    %33 = vector.multi_reduction <add>, %32, %cst_6 [1] : vector<8x16xf32> to vector<8xf32>
    %34 = vector.shape_cast %33 : vector<8xf32> to vector<8x1xf32>
    %c1_i32 = arith.constant 1 : i32
    %c0_i32 = arith.constant 0 : i32
    %35 = arith.cmpi eq, %c1_i32, %c0_i32 : i32
    %c1_i32_7 = arith.constant 1 : i32
    %36 = arith.select %35, %c1_i32_7, %c1_i32 : i32
    %37 = arith.remsi %arg0, %36 : i32
    %c0_i32_8 = arith.constant 0 : i32
    %38 = arith.cmpi ne, %37, %c0_i32_8 : i32
    %c0_i32_9 = arith.constant 0 : i32
    %39 = arith.cmpi slt, %37, %c0_i32_9 : i32
    %c0_i32_10 = arith.constant 0 : i32
    %40 = arith.cmpi slt, %36, %c0_i32_10 : i32
    %41 = arith.xori %39, %40 : i1
    %42 = arith.andi %41, %38 : i1
    %43 = arith.addi %37, %36 : i32
    %44 = arith.select %42, %43, %37 : i32
    %c8_i32_11 = arith.constant 8 : i32
    %45 = arith.muli %44, %c8_i32_11 : i32
    %46 = tpu.assume_multiple %45, 8 : i32
    %47 = arith.index_cast %46 : i32 to index
    %c0_12 = arith.constant 0 : index
    %48 = vector.load %arg2[%47, %c0_12] : memref<8x128xf32, #tpu.memory_space<vmem>>, vector<8x128xf32>
    %49 = arith.mulf %48, %48 : vector<8x128xf32>
    %cst_13 = arith.constant dense<0.000000e+00> : vector<8xf32>
    %50 = vector.multi_reduction <add>, %49, %cst_13 [1] : vector<8x128xf32> to vector<8xf32>
    %51 = vector.shape_cast %50 : vector<8xf32> to vector<8x1xf32>
    %c0_14 = arith.constant 0 : index
    %c0_15 = arith.constant 0 : index
    %52 = vector.load %arg3[%c0_14, %c0_15] : memref<1x8xf32, #tpu.memory_space<vmem>>, vector<1x8xf32>
    %c0_16 = arith.constant 0 : index
    %c0_17 = arith.constant 0 : index
    %53 = vector.load %arg2[%c0_16, %c0_17] : memref<8x128xf32, #tpu.memory_space<vmem>>, vector<8x128xf32>
    %cst_18 = arith.constant dense<0.000000e+00> : vector<8x8xf32>
    %54 = tpu.matmul %48, %53, %cst_18 {dimension_numbers = #tpu.dot_dimension_numbers<[1], [1], [0], [0], [0, 0, 1, 0], [], []>} : vector<8x128xf32>, vector<8x128xf32>, vector<8x8xf32> -> vector<8x8xf32>
    %55 = vector.broadcast %51 : vector<8x1xf32> to vector<8x8xf32>
    %56 = vector.broadcast %52 : vector<1x8xf32> to vector<8x8xf32>
    %57 = arith.addf %55, %56 : vector<8x8xf32>
    %cst_19 = arith.constant 2.000000e+00 : f32
    %58 = vector.broadcast %cst_19 : f32 to vector<8x8xf32>
    %59 = arith.mulf %58, %54 : vector<8x8xf32>
    %60 = arith.subf %57, %59 : vector<8x8xf32>
    %cst_20 = arith.constant -1.000000e+00 : f32
    %61 = vector.broadcast %cst_20 : f32 to vector<8x8xf32>
    %62 = arith.mulf %61, %60 : vector<8x8xf32>
    %63 = arith.negf %62 : vector<8x8xf32>
    %64 = math.exp %63 : vector<8x8xf32>
    %cst_21 = arith.constant 1.000000e+00 : f32
    %65 = vector.broadcast %cst_21 : f32 to vector<8x8xf32>
    %66 = arith.addf %65, %64 : vector<8x8xf32>
    %67 = arith.divf %65, %66 : vector<8x8xf32>
    %cst_22 = arith.constant 1.000000e+00 : f32
    %68 = vector.broadcast %cst_22 : f32 to vector<8x8xf32>
    %69 = arith.mulf %68, %67 : vector<8x8xf32>
    %70 = vector.extract_strided_slice %69 {offsets = [0, 1], sizes = [8, 7], strides = [1, 1]} : vector<8x8xf32> to vector<8x7xf32>
    %71 = vector.extract_strided_slice %69 {offsets = [0, 0], sizes = [8, 1], strides = [1, 1]} : vector<8x8xf32> to vector<8x1xf32>
    %72 = tpu.concatenate %70, %71 in 1 : vector<8x7xf32>, vector<8x1xf32> -> vector<8x8xf32>
    %73 = math.log %34 : vector<8x1xf32>
    %74 = arith.addf %73, %29 : vector<8x1xf32>
    %75 = vector.broadcast %74 : vector<8x1xf32> to vector<8x16xf32>
    %76 = arith.subf %75, %25 : vector<8x16xf32>
    %cst_23 = arith.constant 0.000000e+00 : f32
    %77 = vector.broadcast %cst_23 : f32 to vector<8x16xf32>
    %78 = arith.select %13, %76, %77 : vector<8x16xi1>, vector<8x16xf32>
    %cst_24 = arith.constant 0.000000e+00 : f32
    %79 = vector.broadcast %cst_24 : f32 to vector<8x16xf32>
    %80 = arith.select %17, %76, %79 : vector<8x16xi1>, vector<8x16xf32>
    %81 = vector.extract_strided_slice %78 {offsets = [0, 0], sizes = [8, 8], strides = [1, 1]} : vector<8x16xf32> to vector<8x8xf32>
    %82 = vector.extract_strided_slice %78 {offsets = [0, 8], sizes = [8, 8], strides = [1, 1]} : vector<8x16xf32> to vector<8x8xf32>
    %83 = arith.addf %81, %82 : vector<8x8xf32>
    %84 = arith.mulf %83, %69 : vector<8x8xf32>
    %85 = vector.shape_cast %84 : vector<8x8xf32> to vector<1x8x8xf32>
    %cst_25 = arith.constant dense<0.000000e+00> : vector<1xf32>
    %86 = vector.multi_reduction <add>, %85, %cst_25 [1, 2] : vector<1x8x8xf32> to vector<1xf32>
    %87 = vector.shape_cast %86 : vector<1xf32> to vector<1x1x1xf32>
    %88 = vector.extract %87[0, 0, 0] : f32 from vector<1x1x1xf32>
    %89 = vector.extract_strided_slice %80 {offsets = [0, 0], sizes = [8, 8], strides = [1, 1]} : vector<8x16xf32> to vector<8x8xf32>
    %90 = vector.extract_strided_slice %80 {offsets = [0, 8], sizes = [8, 8], strides = [1, 1]} : vector<8x16xf32> to vector<8x8xf32>
    %91 = arith.addf %89, %90 : vector<8x8xf32>
    %92 = arith.mulf %91, %72 : vector<8x8xf32>
    %93 = vector.shape_cast %92 : vector<8x8xf32> to vector<1x8x8xf32>
    %cst_26 = arith.constant dense<0.000000e+00> : vector<1xf32>
    %94 = vector.multi_reduction <add>, %93, %cst_26 [1, 2] : vector<1x8x8xf32> to vector<1xf32>
    %95 = vector.shape_cast %94 : vector<1xf32> to vector<1x1x1xf32>
    %96 = vector.extract %95[0, 0, 0] : f32 from vector<1x1x1xf32>
    %97 = arith.addf %88, %96 : f32
    %98 = vector.shape_cast %69 : vector<8x8xf32> to vector<1x8x8xf32>
    %cst_27 = arith.constant dense<0.000000e+00> : vector<1xf32>
    %99 = vector.multi_reduction <add>, %98, %cst_27 [1, 2] : vector<1x8x8xf32> to vector<1xf32>
    %100 = vector.shape_cast %99 : vector<1xf32> to vector<1x1x1xf32>
    %101 = vector.extract %100[0, 0, 0] : f32 from vector<1x1x1xf32>
    %cst_28 = arith.constant 2.000000e+00 : f32
    %102 = arith.mulf %cst_28, %101 : f32
    %103 = vector.broadcast %97 : f32 to vector<8x128xf32>
    %c0_29 = arith.constant 0 : index
    %c0_30 = arith.constant 0 : index
    %104 = vector.load %arg4[%c0_29, %c0_30] : memref<8x128xf32, #tpu.memory_space<vmem>>, vector<8x128xf32>
    tpu.vector_store %arg4[%c0_29, %c0_30], %103 {strides = array<i32>} : memref<8x128xf32, #tpu.memory_space<vmem>>, vector<8x128xf32>,
    %105 = vector.broadcast %102 : f32 to vector<8x128xf32>
    %c0_31 = arith.constant 0 : index
    %c0_32 = arith.constant 0 : index
    %106 = vector.load %arg5[%c0_31, %c0_32] : memref<8x128xf32, #tpu.memory_space<vmem>>, vector<8x128xf32>
    tpu.vector_store %arg5[%c0_31, %c0_32], %105 {strides = array<i32>} : memref<8x128xf32, #tpu.memory_space<vmem>>, vector<8x128xf32>,
    return
  }
  func.func @transform_0(%arg0: i32) -> (i32, i32) {
    %c0_i32 = arith.constant 0 : i32
    %c0_i32_0 = arith.constant 0 : i32
    %c0_i32_1 = arith.constant 0 : i32
    return %c0_i32, %c0_i32_0 : i32, i32
  }
  func.func @transform_1(%arg0: i32) -> (i32, i32) {
    %c0_i32 = arith.constant 0 : i32
    %c0_i32_0 = arith.constant 0 : i32
    %c0_i32_1 = arith.constant 0 : i32
    return %c0_i32, %c0_i32_0 : i32, i32
  }
  func.func @transform_2(%arg0: i32) -> (i32, i32) {
    %c0_i32 = arith.constant 0 : i32
    %c0_i32_0 = arith.constant 0 : i32
    %c0_i32_1 = arith.constant 0 : i32
    return %c0_i32, %c0_i32_0 : i32, i32
  }
  func.func @transform_3(%arg0: i32) -> (i32, i32) {
    %c0_i32 = arith.constant 0 : i32
    %c0_i32_0 = arith.constant 0 : i32
    return %c0_i32, %arg0 : i32, i32
  }
  func.func @transform_4(%arg0: i32) -> (i32, i32) {
    %c0_i32 = arith.constant 0 : i32
    %c0_i32_0 = arith.constant 0 : i32
    return %c0_i32, %arg0 : i32, i32
  }
}

module attributes {stable_mosaic.version = 11 : i64} {
  func.func @_softclt_kernel(%arg0: i32, %arg1: memref<16x128xf32, #tpu.memory_space<vmem>>, %arg2: memref<8x128xf32, #tpu.memory_space<vmem>>, %arg3: memref<1x8xf32, #tpu.memory_space<vmem>>, %arg4: memref<8x128xf32, #tpu.memory_space<vmem>>, %arg5: memref<8x128xf32, #tpu.memory_space<vmem>>) attributes {dimension_semantics = [#tpu.dimension_semantics<parallel>], iteration_bounds = array<i64: 2>, scalar_prefetch = 0 : i64, scratch_operands = 0 : i64, tpu.core_type = #tpu.core_type<tc>, window_params = [{pipeline_mode = #tpu.pipeline_mode<synchronous>, transform_indices = @transform_0, window_bounds = array<i64: 16, 128>}, {pipeline_mode = #tpu.pipeline_mode<synchronous>, transform_indices = @transform_1, window_bounds = array<i64: 8, 128>}, {pipeline_mode = #tpu.pipeline_mode<synchronous>, transform_indices = @transform_2, window_bounds = array<i64: 1, 8>}, {transform_indices = @transform_3, window_bounds = array<i64: 8, 128>}, {transform_indices = @transform_4, window_bounds = array<i64: 8, 128>}]} {
    %c8_i32 = arith.constant 8 : i32
    %0 = arith.muli %arg0, %c8_i32 : i32
    %1 = tpu.assume_multiple %0, 8 : i32
    %c0 = arith.constant 0 : index
    %c0_0 = arith.constant 0 : index
    %2 = vector.load %arg1[%c0, %c0_0] : memref<16x128xf32, #tpu.memory_space<vmem>>, vector<16x128xf32>
    %3 = arith.index_cast %1 : i32 to index
    %c0_1 = arith.constant 0 : index
    %4 = vector.load %arg1[%3, %c0_1] : memref<16x128xf32, #tpu.memory_space<vmem>>, vector<8x128xf32>
    %cst = arith.constant dense<0.000000e+00> : vector<8x16xf32>
    %5 = tpu.matmul %4, %2, %cst {dimension_numbers = #tpu.dot_dimension_numbers<[1], [1], [0], [0], [0, 0, 1, 0], [], []>} : vector<8x128xf32>, vector<16x128xf32>, vector<8x16xf32> -> vector<8x16xf32>
    %6 = tpu.iota {dimensions = array<i32: 1>} : vector<8x16xi32>
    %7 = tpu.iota {dimensions = array<i32: 0>} : vector<8x16xi32>
    %8 = vector.broadcast %1 : i32 to vector<8x16xi32>
    %9 = arith.addi %8, %7 : vector<8x16xi32>
    %c15_i32 = arith.constant 15 : i32
    %10 = vector.broadcast %c15_i32 : i32 to vector<8x16xi32>
    %11 = arith.cmpi slt, %6, %10 : vector<8x16xi32>
    %12 = arith.cmpi slt, %6, %9 : vector<8x16xi32>
    %13 = arith.andi %12, %11 : vector<8x16xi1>
    %c2_i32 = arith.constant 2 : i32
    %14 = vector.broadcast %c2_i32 : i32 to vector<8x16xi32>
    %15 = arith.subi %9, %14 : vector<8x16xi32>
    %16 = arith.cmpi sge, %6, %15 : vector<8x16xi32>
    %17 = arith.andi %16, %11 : vector<8x16xi1>
    %18 = vector.extract_strided_slice %5 {offsets = [0, 1], sizes = [8, 15], strides = [1, 1]} : vector<8x16xf32> to vector<8x15xf32>
    %19 = vector.extract_strided_slice %5 {offsets = [0, 0], sizes = [8, 1], strides = [1, 1]} : vector<8x16xf32> to vector<8x1xf32>
    %20 = tpu.concatenate %18, %19 in 1 : vector<8x15xf32>, vector<8x1xf32> -> vector<8x16xf32>
    %cst_2 = arith.constant 0.000000e+00 : f32
    %21 = vector.broadcast %cst_2 : f32 to vector<8x16xf32>
    %22 = arith.select %13, %5, %21 : vector<8x16xi1>, vector<8x16xf32>
    %cst_3 = arith.constant 0.000000e+00 : f32
    %23 = vector.broadcast %cst_3 : f32 to vector<8x16xf32>
    %24 = arith.select %17, %20, %23 : vector<8x16xi1>, vector<8x16xf32>
    %25 = arith.addf %22, %24 : vector<8x16xf32>
    %cst_4 = arith.constant 0xFF800000 : f32
    %26 = vector.broadcast %cst_4 : f32 to vector<8x16xf32>
    %27 = arith.select %11, %25, %26 : vector<8x16xi1>, vector<8x16xf32>
    %cst_5 = arith.constant dense<0xFF800000> : vector<8xf32>
    %28 = vector.multi_reduction <maximumf>, %27, %cst_5 [1] : vector<8x16xf32> to vector<8xf32>
    %29 = vector.shape_cast %28 : vector<8xf32> to vector<8x1xf32>
    %30 = vector.broadcast %29 : vector<8x1xf32> to vector<8x16xf32>
    %31 = arith.subf %27, %30 : vector<8x16xf32>
    %32 = math.exp %31 : vector<8x16xf32>
    %cst_6 = arith.constant dense<0.000000e+00> : vector<8xf32>
    %33 = vector.multi_reduction <add>, %32, %cst_6 [1] : vector<8x16xf32> to vector<8xf32>
    %34 = vector.shape_cast %33 : vector<8xf32> to vector<8x1xf32>
    %c1_i32 = arith.constant 1 : i32
    %c0_i32 = arith.constant 0 : i32
    %35 = arith.cmpi eq, %c1_i32, %c0_i32 : i32
    %c1_i32_7 = arith.constant 1 : i32
    %36 = arith.select %35, %c1_i32_7, %c1_i32 : i32
    %37 = arith.remsi %arg0, %36 : i32
    %c0_i32_8 = arith.constant 0 : i32
    %38 = arith.cmpi ne, %37, %c0_i32_8 : i32
    %c0_i32_9 = arith.constant 0 : i32
    %39 = arith.cmpi slt, %37, %c0_i32_9 : i32
    %c0_i32_10 = arith.constant 0 : i32
    %40 = arith.cmpi slt, %36, %c0_i32_10 : i32
    %41 = arith.xori %39, %40 : i1
    %42 = arith.andi %41, %38 : i1
    %43 = arith.addi %37, %36 : i32
    %44 = arith.select %42, %43, %37 : i32
    %c8_i32_11 = arith.constant 8 : i32
    %45 = arith.muli %44, %c8_i32_11 : i32
    %46 = tpu.assume_multiple %45, 8 : i32
    %47 = arith.index_cast %46 : i32 to index
    %c0_12 = arith.constant 0 : index
    %48 = vector.load %arg2[%47, %c0_12] : memref<8x128xf32, #tpu.memory_space<vmem>>, vector<8x128xf32>
    %49 = arith.mulf %48, %48 : vector<8x128xf32>
    %cst_13 = arith.constant dense<0.000000e+00> : vector<8xf32>
    %50 = vector.multi_reduction <add>, %49, %cst_13 [1] : vector<8x128xf32> to vector<8xf32>
    %51 = vector.shape_cast %50 : vector<8xf32> to vector<8x1xf32>
    %c0_14 = arith.constant 0 : index
    %c0_15 = arith.constant 0 : index
    %52 = vector.load %arg3[%c0_14, %c0_15] : memref<1x8xf32, #tpu.memory_space<vmem>>, vector<1x8xf32>
    %c0_16 = arith.constant 0 : index
    %c0_17 = arith.constant 0 : index
    %53 = vector.load %arg2[%c0_16, %c0_17] : memref<8x128xf32, #tpu.memory_space<vmem>>, vector<8x128xf32>
    %cst_18 = arith.constant dense<0.000000e+00> : vector<8x8xf32>
    %54 = tpu.matmul %48, %53, %cst_18 {dimension_numbers = #tpu.dot_dimension_numbers<[1], [1], [0], [0], [0, 0, 1, 0], [], []>} : vector<8x128xf32>, vector<8x128xf32>, vector<8x8xf32> -> vector<8x8xf32>
    %55 = vector.broadcast %51 : vector<8x1xf32> to vector<8x8xf32>
    %56 = vector.broadcast %52 : vector<1x8xf32> to vector<8x8xf32>
    %57 = arith.addf %55, %56 : vector<8x8xf32>
    %cst_19 = arith.constant 2.000000e+00 : f32
    %58 = vector.broadcast %cst_19 : f32 to vector<8x8xf32>
    %59 = arith.mulf %58, %54 : vector<8x8xf32>
    %60 = arith.subf %57, %59 : vector<8x8xf32>
    %cst_20 = arith.constant -1.000000e+00 : f32
    %61 = vector.broadcast %cst_20 : f32 to vector<8x8xf32>
    %62 = arith.mulf %61, %60 : vector<8x8xf32>
    %63 = arith.negf %62 : vector<8x8xf32>
    %64 = math.exp %63 : vector<8x8xf32>
    %cst_21 = arith.constant 1.000000e+00 : f32
    %65 = vector.broadcast %cst_21 : f32 to vector<8x8xf32>
    %66 = arith.addf %65, %64 : vector<8x8xf32>
    %67 = arith.divf %65, %66 : vector<8x8xf32>
    %cst_22 = arith.constant 1.000000e+00 : f32
    %68 = vector.broadcast %cst_22 : f32 to vector<8x8xf32>
    %69 = arith.mulf %68, %67 : vector<8x8xf32>
    %70 = vector.extract_strided_slice %69 {offsets = [0, 1], sizes = [8, 7], strides = [1, 1]} : vector<8x8xf32> to vector<8x7xf32>
    %71 = vector.extract_strided_slice %69 {offsets = [0, 0], sizes = [8, 1], strides = [1, 1]} : vector<8x8xf32> to vector<8x1xf32>
    %72 = tpu.concatenate %70, %71 in 1 : vector<8x7xf32>, vector<8x1xf32> -> vector<8x8xf32>
    %73 = math.log %34 : vector<8x1xf32>
    %74 = arith.addf %73, %29 : vector<8x1xf32>
    %75 = vector.broadcast %74 : vector<8x1xf32> to vector<8x16xf32>
    %76 = arith.subf %75, %25 : vector<8x16xf32>
    %cst_23 = arith.constant 0.000000e+00 : f32
    %77 = vector.broadcast %cst_23 : f32 to vector<8x16xf32>
    %78 = arith.select %13, %76, %77 : vector<8x16xi1>, vector<8x16xf32>
    %cst_24 = arith.constant 0.000000e+00 : f32
    %79 = vector.broadcast %cst_24 : f32 to vector<8x16xf32>
    %80 = arith.select %17, %76, %79 : vector<8x16xi1>, vector<8x16xf32>
    %81 = vector.extract_strided_slice %78 {offsets = [0, 0], sizes = [8, 8], strides = [1, 1]} : vector<8x16xf32> to vector<8x8xf32>
    %82 = vector.extract_strided_slice %78 {offsets = [0, 8], sizes = [8, 8], strides = [1, 1]} : vector<8x16xf32> to vector<8x8xf32>
    %83 = arith.addf %81, %82 : vector<8x8xf32>
    %84 = arith.mulf %83, %69 : vector<8x8xf32>
    %85 = vector.shape_cast %84 : vector<8x8xf32> to vector<1x8x8xf32>
    %cst_25 = arith.constant dense<0.000000e+00> : vector<1xf32>
    %86 = vector.multi_reduction <add>, %85, %cst_25 [1, 2] : vector<1x8x8xf32> to vector<1xf32>
    %87 = vector.shape_cast %86 : vector<1xf32> to vector<1x1x1xf32>
    %88 = vector.extract %87[0, 0, 0] : f32 from vector<1x1x1xf32>
    %89 = vector.extract_strided_slice %80 {offsets = [0, 0], sizes = [8, 8], strides = [1, 1]} : vector<8x16xf32> to vector<8x8xf32>
    %90 = vector.extract_strided_slice %80 {offsets = [0, 8], sizes = [8, 8], strides = [1, 1]} : vector<8x16xf32> to vector<8x8xf32>
    %91 = arith.addf %89, %90 : vector<8x8xf32>
    %92 = arith.mulf %91, %72 : vector<8x8xf32>
    %93 = vector.shape_cast %92 : vector<8x8xf32> to vector<1x8x8xf32>
    %cst_26 = arith.constant dense<0.000000e+00> : vector<1xf32>
    %94 = vector.multi_reduction <add>, %93, %cst_26 [1, 2] : vector<1x8x8xf32> to vector<1xf32>
    %95 = vector.shape_cast %94 : vector<1xf32> to vector<1x1x1xf32>
    %96 = vector.extract %95[0, 0, 0] : f32 from vector<1x1x1xf32>
    %97 = arith.addf %88, %96 : f32
    %98 = vector.shape_cast %69 : vector<8x8xf32> to vector<1x8x8xf32>
    %cst_27 = arith.constant dense<0.000000e+00> : vector<1xf32>
    %99 = vector.multi_reduction <add>, %98, %cst_27 [1, 2] : vector<1x8x8xf32> to vector<1xf32>
    %100 = vector.shape_cast %99 : vector<1xf32> to vector<1x1x1xf32>
    %101 = vector.extract %100[0, 0, 0] : f32 from vector<1x1x1xf32>
    %cst_28 = arith.constant 2.000000e+00 : f32
    %102 = arith.mulf %cst_28, %101 : f32
    %103 = vector.broadcast %97 : f32 to vector<8x128xf32>
    %c0_29 = arith.constant 0 : index
    %c0_30 = arith.constant 0 : index
    %104 = vector.load %arg4[%c0_29, %c0_30] : memref<8x128xf32, #tpu.memory_space<vmem>>, vector<8x128xf32>
    tpu.vector_store %arg4[%c0_29, %c0_30], %103 {strides = array<i32>} : memref<8x128xf32, #tpu.memory_space<vmem>>, vector<8x128xf32>,
    %105 = vector.broadcast %102 : f32 to vector<8x128xf32>
    %c0_31 = arith.constant 0 : index
    %c0_32 = arith.constant 0 : index
    %106 = vector.load %arg5[%c0_31, %c0_32] : memref<8x128xf32, #tpu.memory_space<vmem>>, vector<8x128xf32>
    tpu.vector_store %arg5[%c0_31, %c0_32], %105 {strides = array<i32>} : memref<8x128xf32, #tpu.memory_space<vmem>>, vector<8x128xf32>,
    return
  }
  func.func @transform_0(%arg0: i32) -> (i32, i32) {
    %c0_i32 = arith.constant 0 : i32
    %c0_i32_0 = arith.constant 0 : i32
    %c0_i32_1 = arith.constant 0 : i32
    return %c0_i32, %c0_i32_0 : i32, i32
  }
  func.func @transform_1(%arg0: i32) -> (i32, i32) {
    %c0_i32 = arith.constant 0 : i32
    %c0_i32_0 = arith.constant 0 : i32
    %c0_i32_1 = arith.constant 0 : i32
    return %c0_i32, %c0_i32_0 : i32, i32
  }
  func.func @transform_2(%arg0: i32) -> (i32, i32) {
    %c0_i32 = arith.constant 0 : i32
    %c0_i32_0 = arith.constant 0 : i32
    %c0_i32_1 = arith.constant 0 : i32
    return %c0_i32, %c0_i32_0 : i32, i32
  }
  func.func @transform_3(%arg0: i32) -> (i32, i32) {
    %c0_i32 = arith.constant 0 : i32
    %c0_i32_0 = arith.constant 0 : i32
    return %c0_i32, %arg0 : i32, i32
  }
  func.func @transform_4(%arg0: i32) -> (i32, i32) {
    %c0_i32 = arith.constant 0 : i32
    %c0_i32_0 = arith.constant 0 : i32
    return %c0_i32, %arg0 : i32, i32
  }
}

</mosaic_0001>

<bundles_post_ra>
// kernel: tpu_custom_call.1
= control target key start
LH: loop header
LB: loop body
LE: loop exit
PB: predicated region body
PF: predicated region fallthrough
CT: control target
= control target key end

     0   :  { %10 = vsyncpa [#allocation3], 0  ;;  %s1125_s0 = inlined_call_operand.hbm [shape: f32[16,128], index: 0, kind: input, shape index: {}]   ;;  %s1126_s1 = inlined_call_operand.hbm [shape: f32[8,128], index: 1, kind: input, shape index: {}]   ;;  %s1127_s2 = inlined_call_operand.vmem [shape: f32[1,8], index: 2, kind: input, shape index: {}]   ;;  %s1128_s3 = inlined_call_operand.hbm [shape: f32[8,256], index: 3, kind: output, shape index: {0}]   ;;  %s1129_s4 = inlined_call_operand.hbm [shape: f32[8,256], index: 4, kind: output, shape index: {1}]  }
   0x1   :  { %11 = vsyncpa [#allocation6], 0 }
   0x2   :  { %12 = vsyncpa [#allocation4], 0 }
   0x3   :  { %14 = vsyncpa [#allocation4 + $0x1], 0 }
   0x4   :  { %15 = vsyncpa [#allocation9], 0 }
   0x5   :  { %17 = vsyncpa [#allocation9 + $0x1], 0  ;;  %s927_s15 = smov 0   ;;  %s929_s16 = smov 0  }
   0x6   :  { %s931_s17 = smov 0   ;;  %s933_s18 = smov 0  }
   0x7 LB: > { %s948_s19 = sadd.s32 4294967295, %s888_s18   ;;  %s616_s20 = sadd.s32 4294967294, %s888_s18   ;;  %s888_s18 = sphi %s933_s18, %s1147_s18   ;;  %s884_s17 = sphi %s931_s17, %s1146_s17   ;;  %s880_s16 = sphi %s929_s16, %s1145_s16   ;;  %s876_s15 = sphi %s927_s15, %s1144_s15  }
   0x8   : > { %s952_s21 = sadd.s32 1, %s888_s18   ;;  %s93_s22 = sadd.s32 1, %s884_s17 }
   0x9   : > { %s90_s23 = ssub.s32 %s888_s18, %s952_s21  ;;  %p103_p0 = scmp.ne.s32.totalorder %s884_s17, %s880_s16 }
   0xa   : > { %p91_p1 = scmp.eq.s32.totalorder %s90_s23, 0  ;;  %p104_p2 = scmp.eq.s32.totalorder %s948_s19, 1 }
   0xb   : > { %p109_p3 = scmp.ne.s32.totalorder %s880_s16, %s876_s15  ;;  %p110_p4 = scmp.eq.s32.totalorder %s616_s20, 1 }
   0xc   : > { %s963_s24 = scalar_select %p91_p1, %s884_s17, %s93_s22  }
   0xd   : > { %p965_p5 = por %p104_p2, %p103_p0  ;;  %p969_p6 = por %p110_p4, %p109_p3 }
   0xe   : > { %p617_p7 = scmp.ge.s32.totalorder %s888_s18, 1  ;;  %p143_p8 = scmp.lt.s32.totalorder %s888_s18, 3 }
   0xf   : > { %s1132_s26 = scalar_select %p969_p6, 1, 0 }
  0x10   : > { %p1130_p9 = scmp.eq.s32.totalorder %s948_s19, 0  ;;  %p976_p10 = pnand %p617_p7, %p143_p8 }
  0x11   : > { %s890_s28 = smov [#allocation2]   ;;  %s891_s5 = smov [#allocation5]  }
  0x12   : > { %s155_s29 = sshll.u32 %s890_s28, 4  ;;  %p669_p11 = pneg %p976_p10  ;;  %s156_s29 = int_to_ptr.vmem [resolvable:$true] %s155_s29 }
  0x13   : > { %s169_s6 = sshll.u32 %s891_s5, 4  ;;  %s749_s7 = scalar_lea.vmem %s156_s29, 256  ;;  %s170_s6 = int_to_ptr.vmem [resolvable:$true] %s169_s6 }
  0x14   : > { %p984_p12 = pnand %p1130_p9, %p669_p11  ;;  %p750_p0 = scmp.ne.s32.totalorder %s156_s29, %s749_s7 }
  0x15   : > { %p757_p3 = scmp.lt.s32.totalorder %s156_s29, %s156_s29  ;;  %p758_p4 = scmp.lt.s32.totalorder %s749_s7, %s749_s7 }
  0x16   : > { %p740_p13 = pneg %p984_p12 }
  0x17   : > { %p759_p7 = por %p758_p4, %p757_p3 }
  0x18   : > { %p752_p1 = pnand %p750_p0, %p740_p13 }
  0x1a   : > { %p753_p2 = pneg %p752_p1 }
  0x1c   : > { %p760_p8 = pnand %p759_p7, %p753_p2 }
  0x1e   : > { %763 = shalt.err (!%p760_p8)
}
  0x1f   : > { %s892_s8 = smov 128   ;;  %s893_s9 = smov 8  }
  0x20   : > { %672 = dma.hbm_to_vmem [thread:$0]  (!%p984_p12), %s1125_s0, 256, %s156_s29, [#allocation3], %s892_s8, %s892_s8, %s893_s9  }
  0x21   : > { %s775_s12 = scalar_lea.vmem %s170_s6, 128  ;;  %p783_p9 = scmp.lt.s32.totalorder %s170_s6, %s170_s6 }
  0x22   : > { %p776_p11 = scmp.ne.s32.totalorder %s170_s6, %s775_s12  ;;  %p784_p6 = scmp.lt.s32.totalorder %s775_s12, %s775_s12 }
  0x24   : > { %p778_p0 = pnand %p776_p11, %p740_p13  ;;  %p785_p3 = por %p784_p6, %p783_p9 }
  0x26   : > { %p779_p1 = pneg %p778_p0 }
  0x28   : > { %p786_p2 = pnand %p785_p3, %p779_p1 }
  0x2a   : > { %789 = shalt.err (!%p786_p2)
}
  0x2b   : > { %675 = dma.hbm_to_vmem [thread:$0]  (!%p984_p12), %s1126_s1, 128, %s170_s6, [#allocation6]  }
  0x2c   : > { %185 = sbr.rel (%p976_p10) target bundleno = 1070 (0x42e), region = 32  ;;  %p1135_p4 = scmp.eq.s32.totalorder (!%p976_p10), %s948_s19, 0 }
  0x31   : > { %859 = dma.done.wait (%p1135_p4), [#allocation3], 256   ;;  %p1136_p13 = pmov %p1135_p4 }
  0x32   : > { %p1137_p7 = pmov %p1135_p4 }
  0x33   : > { %861 = vsyncadd (%p1136_p13), [#allocation3], 4294967040 }
  0x34   : > { %863 = dma.done.wait (%p1137_p7), [#allocation6], 128   ;;  %p1138_p6 = pmov %p1135_p4 }
  0x35   : > { %v894_v0 = vmov 0.0   ;;  %vm895_vm0 = vmmov 0   ;;  %s625_s20 = sshll.u32 %s948_s19, 3  ;;  %v217_v1 = vld [vmem:[#allocation2 + $0x8] sm:$0xff]  ;;  %v216_v2 = vld [vmem:[#allocation2] sm:$0xff]  ;;  %v330_v4 = vld [vmem:[#allocation5] sm:$0xff]  ;;  %v290_v7 = vlaneseq }
  0x36   : > { %865 = vsyncadd (%p1138_p6), [#allocation6], 4294967168  ;;  %639 = vmatprep.subr.mxu0 %v894_v0  ;;  %643 = vmatprep.mubr.msk.f32.mxu0 %vm895_vm0, %v894_v0  ;;  %s218_s22 = scalar_lea.vmem [#allocation2], %s625_s20  ;;  %s896_s23 = smov 127   ;;  %v294_v9 = vstv %s625_s20  ;;  %vm309_vm4 = vcmask 121856   ;;  %vm315_vm7 = vcmask 130048   ;;  %v326_v23 = vmul.f32 %v330_v4, %v330_v4 }
  0x37   : > { %646 = vmatprep.subr.mxu1 %v894_v0  ;;  %648 = vmatprep.mubr.msk.f32.mxu1 %vm895_vm0, %v894_v0  ;;  %v219_v3 = vld [vmem:[%s218_s22] sm:$0xff]  ;;  %s897_s27 = smov 15   ;;  %v293_v8 = vshrl.u32 %v290_v7, 7  ;;  %v291_v11 = vand.u32 127, %v290_v7  ;;  %s898_s30 = smov 120   ;;  %vm438_vm8 = vcmask 64512  }
  0x38   : > { %640 = vmatpush3.xpose.msra.mxu0 %v217_v1  ;;  %647 = vmatpush3.xpose.msra.mxu1 %v330_v4  ;;  %v627_v29 = vld [vmem:[%s1127_s2] ss:$0 sm:$0xff]  ;;  %s899_s5 = smov 7   ;;  %vm424_vm9 = vcmask 56320   ;;  %s1041_s6 = sand.u32 1, %s880_s16  }
  0x39   : > { %641 = vmatprep.subr.mxu0 %v894_v0  ;;  %v295_v10 = vadd.s32 %v294_v9, %v293_v8  ;;  %vm296_vm1 = vcmp.lt.s32.totalorder %v291_v11, 15  ;;  %s623_s7 = sshll.u32 %s1041_s6, 3  ;;  %s630_s9 = sshll.u32 %s948_s19, 7 }
  0x3a   : > { %s207_s11 = scalar_lea.vmem [#allocation7], %s623_s7  ;;  %s1045_s14 = scalar_lea.vmem [#allocation8], %s623_s7 }
  0x3b   : > { %649 = vmatmul.mubr.f32.vlgmr.msra.gmra.mxu1 %v330_v4  ;;  %v626_v12 = vadd.s32 4294967294, %v295_v10  ;;  %vm297_vm2 = vcmp.lt.s32.totalorder %v291_v11, %v295_v10  ;;  %s500_s12 = sshll.u32 %s207_s11, 4  ;;  %s513_s20 = sshll.u32 %s1045_s14, 4  ;;  %s1053_s12 = int_to_ptr.vmem [resolvable:$true] %s500_s12  ;;  %s1063_s20 = int_to_ptr.vmem [resolvable:$true] %s513_s20 }
  0x3c   : > { %642 = vmatpush3.xpose.msra.mxu0 %v216_v2  ;;  %vm1018_vm5 = vmand %vm297_vm2, %vm296_vm1  ;;  %s482_s7 = scalar_lea.sflag [#allocation4], %s1041_s6 }
  0x3d   : > { %vm300_vm3 = vcmp.ge.s32.totalorder %v291_v11, %v626_v12 }
  0x3e   : > { %vm1022_vm6 = vmand %vm300_vm3, %vm296_vm1 }
  0x3f   : > { %644 = vmatmul.mubr.f32.vlgmr.msra.gmra.mxu0 %v219_v3 }
  0xfb   : > { %v397_v24 = vpop.f32.mrf.mxu1 }
  0xfc   : > { %v408_v30 = vmul.f32 2.0, %v397_v24 }
  0xfd   : > { %v650_v25 = vpop.f32.mrf.mxu1 }
  0xff   : > { %v286_v5 = vpop.f32.mrf.mxu0 }
 0x100   : > { %303 = vrot.lane.b32.xlu0 %v286_v5, %s896_s23  ;;  %v311_v19 = vsel %vm1018_vm5, %v286_v5, 0.0 }
 0x101   : > { %v645_v6 = vpop.f32.mrf.mxu0 }
 0x104   : > { %306 = vrot.lane.b32.xlu0 %v286_v5, %s897_s27  ;;  %s1051_s27 = scalar_lea.hbm %s1128_s3, %s630_s9 }
 0x172   : > { %v304_v13 = vpop.permute.xlu0 %303 }
 0x176   : > { %v307_v16 = vpop.permute.xlu0 %306 }
 0x177   : > { %v310_v17 = vsel %vm309_vm4, %v304_v13, %v307_v16 }
 0x178   : > { %v312_v18 = vsel %vm1022_vm6, %v310_v17, 0.0 }
 0x179   : > { %v313_v20 = vadd.f32 %v312_v18, %v311_v19 }
 0x17b   : > { %v314_v21 = vsel %vm296_vm1, %v313_v20, -inf }
 0x17c   : > { %v316_v22 = vsel %vm315_vm7, %v314_v21, -inf }
 0x17d   : > { %317 = vmax.xlane.f32.xlu1 %v316_v22 }
 0x181   : > { %327 = vadd.xlane.f32.xlu1 %v326_v23 }
 0x206   : > { %v318_v26 = vpop.xlane.xlu1 %317 }
 0x207   : > { %v319_v27 = vsub.f32 %v314_v21, %v318_v26 }
 0x209   : > { %v320_v28 = vmul.f32 1.442695, %v319_v27 }
 0x20a   : > { %v328_v31 = vpop.xlane.xlu1 %327 }
 0x20b   : > { %730 = vpow2.f32 %v320_v28  ;;  %v407_v32 = vadd.f32 %v627_v29, %v328_v31 }
 0x20d   : > { %v409_v33 = vsub.f32 %v407_v32, %v408_v30 }
 0x20f   : > { %v412_v34 = vmul.f32 1.442695, %v409_v33 }
 0x211   : > { %732 = vpow2.f32 %v412_v34 }
 0x218   : > { %v731_v35 = vpop.eup %730 }
 0x219   : > { %v322_v36 = vsel %vm315_vm7, %v731_v35, 0.0 }
 0x21a   : > { %323 = vadd.xlane.f32.xlu0 %v322_v36 }
 0x21e   : > { %v733_v37 = vpop.eup %732 }
 0x21f   : > { %v414_v38 = vadd.f32 1.0, %v733_v37 }
 0x221   : > { %734 = vrcp.f32 %v414_v38 }
 0x22e   : > { %v735_v39 = vpop.eup %734 }
 0x22f   : > { %418 = vrot.lane.b32.xlu1 %v735_v39, %s896_s23  ;;  %v466_v58 = vsel %vm438_vm8, %v735_v39, 0.0 }
 0x2a1   : > { %v419_v47 = vpop.permute.xlu1 %418 }
 0x2a3   : > { %v324_v40 = vpop.xlane.xlu0 %323 }
 0x2a4   : > { %736 = vlog2.f32 %v324_v40 }
 0x2b1   : > { %v737_v41 = vpop.eup %736 }
 0x2b2   : > { %v427_v42 = vmul.f32 0.6931472, %v737_v41 }
 0x2b4   : > { %v428_v43 = vadd.f32 %v427_v42, %v318_v26 }
 0x2b6   : > { %v429_v44 = vsub.f32 %v428_v43, %v313_v20 }
 0x2b8   : > { %v430_v45 = vsel %vm1018_vm5, %v429_v44, 0.0  ;;  %v431_v46 = vsel %vm1022_vm6, %v429_v44, 0.0 }
 0x2b9   : > { %433 = vrot.lane.b32.xlu1 %v430_v45, %s898_s30 }
 0x2bd   : > { %450 = vrot.lane.b32.xlu1 %v431_v46, %s898_s30  ;;  %s1060_s30 = scalar_lea.hbm %s1129_s4, %s630_s9 }
 0x2c1   : > { %421 = vrot.lane.b32.xlu1 %v735_v39, %s899_s5 }
 0x32b   : > { %v434_v48 = vpop.permute.xlu1 %433 }
 0x32c   : > { %v436_v49 = vadd.f32 %v434_v48, %v430_v45 }
 0x32e   : > { %v437_v50 = vmul.f32 %v735_v39, %v436_v49 }
 0x32f   : > { %v451_v51 = vpop.permute.xlu1 %450 }
 0x330   : > { %v439_v52 = vsel %vm438_vm8, %v437_v50, 0.0  ;;  %v453_v53 = vadd.f32 %v451_v51, %v431_v46 }
 0x331   : > { %440 = vadd.xlane.f32.xlu1 %v439_v52 }
 0x333   : > { %v422_v54 = vpop.permute.xlu1 %421 }
 0x334   : > { %v425_v55 = vsel %vm424_vm9, %v419_v47, %v422_v54 }
 0x335   : > { %v454_v56 = vmul.f32 %v453_v53, %v425_v55 }
 0x337   : > { %v455_v57 = vsel %vm438_vm8, %v454_v56, 0.0 }
 0x338   : > { %456 = vadd.xlane.f32.xlu0 %v455_v57 }
 0x33c   : > { %467 = vadd.xlane.f32.xlu0 %v466_v58 }
 0x3ba   : > { %v441_v59 = vpop.xlane.xlu1 %440 }
 0x3bb   : > { %v442_v60 = vrot.slane %v441_v59, 4 }
 0x3bd   : > { %v443_v61 = vadd.f32 %v442_v60, %v441_v59 }
 0x3bf   : > { %v444_v62 = vrot.slane %v443_v61, 2 }
 0x3c1   : > { %v457_v63 = vpop.xlane.xlu0 %456  ;;  %v445_v0 = vadd.f32 %v444_v62, %v443_v61 }
 0x3c2   : > { %v458_v1 = vrot.slane %v457_v63, 4 }
 0x3c3   : > { %v446_v2 = vrot.slane %v445_v0, 1 }
 0x3c4   : > { %v459_v3 = vadd.f32 %v458_v1, %v457_v63 }
 0x3c5   : > { %v468_v4 = vpop.xlane.xlu0 %467  ;;  %v447_v5 = vadd.f32 %v446_v2, %v445_v0 }
 0x3c6   : > { %v460_v6 = vrot.slane %v459_v3, 2  ;;  %v469_v7 = vrot.slane %v468_v4, 4 }
 0x3c7   : > { %651 = vpush %v447_v5 }
 0x3c8   : > { %v470_v8 = vadd.f32 %v469_v7, %v468_v4  ;;  %v461_v9 = vadd.f32 %v460_v6, %v459_v3 }
 0x3ca   : > { %v471_v10 = vrot.slane %v470_v8, 2  ;;  %v462_v11 = vrot.slane %v461_v9, 1 }
 0x3cc   : > { %v472_v12 = vadd.f32 %v471_v10, %v470_v8  ;;  %v463_v13 = vadd.f32 %v462_v11, %v461_v9 }
 0x3ce   : > { %653 = vpush %v463_v13  ;;  %v473_v14 = vrot.slane %v472_v12, 1 }
 0x3d0   : > { %v474_v15 = vadd.f32 %v473_v14, %v472_v12 }
 0x3d2   : > { %655 = vpush %v474_v15 }
 0x3f8   : > { %s652_s8 = spop %651 }
 0x3ff   : > { %s654_s10 = spop %653 }
 0x400   : > { %s465_s13 = sadd.f32 %s654_s10, %s652_s8  ;;  %s790_s8 = scalar_lea.vmem %s1053_s12, 128 }
 0x401   : > { %p791_p9 = scmp.ne.s32.totalorder %s1053_s12, %s790_s8  ;;  %s900_s10 = smov [#allocation7]  }
 0x402   : > { %v477_v16 = vstv %s465_s13  ;;  %s794_s13 = sshll.u32 %s900_s10, 4  ;;  %s795_s13 = int_to_ptr.vmem [resolvable:$false] %s794_s13 }
 0x403   : > { %478 = vst [vmem:[%s207_s11] sm:$0xff] %v477_v16  ;;  %s1055_s19 = spop %655  ;;  %p792_p10 = pnand %p791_p9, %p965_p5 }
 0x404   : > { %s476_s5 = smul.f32 2.0, %s1055_s19  ;;  %s796_s11 = scalar_lea.vmem %s795_s13, 256 }
 0x405   : > { %p793_p12 = pneg %p792_p10  ;;  %p797_p8 = scmp.lt.s32.totalorder %s1053_s12, %s795_s13 }
 0x406   : > { %p798_p11 = scmp.lt.s32.totalorder %s796_s11, %s790_s8 }
 0x408   : > { %p799_p0 = por %p798_p11, %p797_p8 }
 0x40a   : > { %p800_p1 = pnand %p799_p0, %p793_p12 }
 0x40c   : > { %803 = shalt.err (!%p800_p1)
}
 0x40d   : > { %s804_s9 = scalar_lea.hbm %s1051_s27, 128  ;;  %s808_s19 = scalar_lea.hbm %s1128_s3, 256 }
 0x40e   : > { %p805_p3 = scmp.ne.s32.totalorder %s1051_s27, %s804_s9  ;;  %p809_p13 = scmp.lt.s32.totalorder %s1051_s27, %s1128_s3 }
 0x40f   : > { %p810_p7 = scmp.lt.s32.totalorder %s808_s19, %s804_s9 }
 0x410   : > { %p806_p2 = pnand %p805_p3, %p965_p5 }
 0x411   : > { %p811_p6 = por %p810_p7, %p809_p13 }
 0x412   : > { %p807_p4 = pneg %p806_p2 }
 0x414   : > { %p812_p9 = pnand %p811_p6, %p807_p4 }
 0x416   : > { %815 = shalt.err (!%p812_p9)
}
 0x417   : > { %665 = dma.vmem_to_hbm [thread:$0]  (%p965_p5), %s1053_s12, 128, %s1051_s27, %s482_s7   ;;  %v479_v17 = vstv %s476_s5 }
 0x418   : > { %480 = vst [vmem:[%s1045_s14] sm:$0xff] %v479_v17  ;;  %s487_s8 = scalar_lea.sflag [#allocation9], %s1041_s6  ;;  %s816_s10 = scalar_lea.vmem %s1063_s20, 128 }
 0x419   : > { %p817_p10 = scmp.ne.s32.totalorder %s1063_s20, %s816_s10  ;;  %s901_s13 = smov [#allocation8]  }
 0x41a   : > { %s820_s11 = sshll.u32 %s901_s13, 4  ;;  %s821_s11 = int_to_ptr.vmem [resolvable:$false] %s820_s11 }
 0x41b   : > { %p818_p12 = pnand %p817_p10, %p965_p5  ;;  %s822_s9 = scalar_lea.vmem %s821_s11, 256 }
 0x41c   : > { %p823_p11 = scmp.lt.s32.totalorder %s1063_s20, %s821_s11  ;;  %p824_p0 = scmp.lt.s32.totalorder %s822_s9, %s816_s10 }
 0x41d   : > { %p819_p8 = pneg %p818_p12 }
 0x41e   : > { %p825_p1 = por %p824_p0, %p823_p11 }
 0x420   : > { %p826_p3 = pnand %p825_p1, %p819_p8 }
 0x422   : > { %829 = shalt.err (!%p826_p3)
}
 0x423   : > { %s830_s12 = scalar_lea.hbm %s1060_s30, 128  ;;  %s834_s27 = scalar_lea.hbm %s1129_s4, 256 }
 0x424   : > { %p831_p2 = scmp.ne.s32.totalorder %s1060_s30, %s830_s12  ;;  %p835_p7 = scmp.lt.s32.totalorder %s1060_s30, %s1129_s4 }
 0x425   : > { %p836_p6 = scmp.lt.s32.totalorder %s834_s27, %s830_s12 }
 0x426   : > { %p832_p4 = pnand %p831_p2, %p965_p5 }
 0x427   : > { %p837_p9 = por %p836_p6, %p835_p7 }
 0x428   : > { %p833_p13 = pneg %p832_p4 }
 0x42a   : > { %p838_p10 = pnand %p837_p9, %p833_p13 }
 0x42c   : > { %841 = shalt.err (!%p838_p10)
}
 0x42d   : > { %666 = dma.vmem_to_hbm [thread:$0]  (%p965_p5), %s1063_s20, 128, %s1060_s30, %s487_s8  }
 0x42e PF: > { %p687_p12 = scmp.ge.s32.totalorder %s888_s18, 2  ;;  %s525_s22 = sand.u32 1, %s876_s15  }
 0x42f   : > { %p1143_p8 = scmp.ne.s32.totalorder %s1132_s26, 0  ;;  %s526_s23 = scalar_lea.sflag [#allocation4], %s525_s22 }
 0x431   : > { %p677_p11 = pnand %p687_p12, %p1143_p8 }
 0x433   : > { %p678_p0 = pneg %p677_p11 }
 0x435   : > { %867 = dma.done.wait (%p678_p0), %s526_s23, 128  }
 0x436   : > { %869 = vsyncadd (%p678_p0), %s526_s23, 4294967168  ;;  %s535_s19 = scalar_lea.sflag [#allocation9], %s525_s22 }
 0x437   : > { %871 = dma.done.wait (%p678_p0), %s535_s19, 128  }
 0x438   : > { %873 = vsyncadd (%p678_p0), %s535_s19, 4294967168  ;;  %p20_p5 = scmp.ge.s32.totalorder %s952_s21, 4   ;;  %s1144_s15 = smov %s880_s16 }
 0x439   : > { %s1145_s16 = smov %s884_s17  ;;  %s1146_s17 = smov %s963_s24 }
 0x43a   : > { %s1147_s18 = smov %s952_s21  ;;  %22 = sbr.rel (!%p20_p5) target bundleno = 7 (0x7), region = 91 }
 0x43f   :  { %540 = vsyncpa [#allocation3], 1 }
 0x440   :  { %542 = vsyncpa [#allocation3 + $0x1], 1 }
 0x441   :  { %543 = vsyncpa [#allocation6], 1 }
 0x442   :  { %544 = vsyncpa [#allocation4], 1 }
 0x443   :  { %546 = vsyncpa [#allocation4 + $0x1], 1 }
 0x444   :  { %547 = vsyncpa [#allocation9], 1 }
 0x445   :  { %549 = vsyncpa [#allocation9 + $0x1], 1 }

// kernel: tpu_custom_call.1
= control target key start
LH: loop header
LB: loop body
LE: loop exit
PB: predicated region body
PF: predicated region fallthrough
CT: control target
= control target key end

     0   :  { %10 = vsyncpa [#allocation3], 0  ;;  %s1125_s0 = inlined_call_operand.hbm [shape: f32[16,128], index: 0, kind: input, shape index: {}]   ;;  %s1126_s1 = inlined_call_operand.hbm [shape: f32[8,128], index: 1, kind: input, shape index: {}]   ;;  %s1127_s2 = inlined_call_operand.vmem [shape: f32[1,8], index: 2, kind: input, shape index: {}]   ;;  %s1128_s3 = inlined_call_operand.hbm [shape: f32[8,256], index: 3, kind: output, shape index: {0}]   ;;  %s1129_s4 = inlined_call_operand.hbm [shape: f32[8,256], index: 4, kind: output, shape index: {1}]  }
   0x1   :  { %11 = vsyncpa [#allocation6], 0 }
   0x2   :  { %12 = vsyncpa [#allocation4], 0 }
   0x3   :  { %14 = vsyncpa [#allocation4 + $0x1], 0 }
   0x4   :  { %15 = vsyncpa [#allocation9], 0 }
   0x5   :  { %17 = vsyncpa [#allocation9 + $0x1], 0  ;;  %s927_s15 = smov 0   ;;  %s929_s16 = smov 0  }
   0x6   :  { %s931_s17 = smov 0   ;;  %s933_s18 = smov 0  }
   0x7 LB: > { %s948_s19 = sadd.s32 4294967295, %s888_s18   ;;  %s616_s20 = sadd.s32 4294967294, %s888_s18   ;;  %s888_s18 = sphi %s933_s18, %s1147_s18   ;;  %s884_s17 = sphi %s931_s17, %s1146_s17   ;;  %s880_s16 = sphi %s929_s16, %s1145_s16   ;;  %s876_s15 = sphi %s927_s15, %s1144_s15  }
   0x8   : > { %s952_s21 = sadd.s32 1, %s888_s18   ;;  %s93_s22 = sadd.s32 1, %s884_s17 }
   0x9   : > { %s90_s23 = ssub.s32 %s888_s18, %s952_s21  ;;  %p103_p0 = scmp.ne.s32.totalorder %s884_s17, %s880_s16 }
   0xa   : > { %p91_p1 = scmp.eq.s32.totalorder %s90_s23, 0  ;;  %p104_p2 = scmp.eq.s32.totalorder %s948_s19, 1 }
   0xb   : > { %p109_p3 = scmp.ne.s32.totalorder %s880_s16, %s876_s15  ;;  %p110_p4 = scmp.eq.s32.totalorder %s616_s20, 1 }
   0xc   : > { %s963_s24 = scalar_select %p91_p1, %s884_s17, %s93_s22  }
   0xd   : > { %p965_p5 = por %p104_p2, %p103_p0  ;;  %p969_p6 = por %p110_p4, %p109_p3 }
   0xe   : > { %p617_p7 = scmp.ge.s32.totalorder %s888_s18, 1  ;;  %p143_p8 = scmp.lt.s32.totalorder %s888_s18, 3 }
   0xf   : > { %s1132_s26 = scalar_select %p969_p6, 1, 0 }
  0x10   : > { %p1130_p9 = scmp.eq.s32.totalorder %s948_s19, 0  ;;  %p976_p10 = pnand %p617_p7, %p143_p8 }
  0x11   : > { %s890_s28 = smov [#allocation2]   ;;  %s891_s5 = smov [#allocation5]  }
  0x12   : > { %s155_s29 = sshll.u32 %s890_s28, 4  ;;  %p669_p11 = pneg %p976_p10  ;;  %s156_s29 = int_to_ptr.vmem [resolvable:$true] %s155_s29 }
  0x13   : > { %s169_s6 = sshll.u32 %s891_s5, 4  ;;  %s749_s7 = scalar_lea.vmem %s156_s29, 256  ;;  %s170_s6 = int_to_ptr.vmem [resolvable:$true] %s169_s6 }
  0x14   : > { %p984_p12 = pnand %p1130_p9, %p669_p11  ;;  %p750_p0 = scmp.ne.s32.totalorder %s156_s29, %s749_s7 }
  0x15   : > { %p757_p3 = scmp.lt.s32.totalorder %s156_s29, %s156_s29  ;;  %p758_p4 = scmp.lt.s32.totalorder %s749_s7, %s749_s7 }
  0x16   : > { %p740_p13 = pneg %p984_p12 }
  0x17   : > { %p759_p7 = por %p758_p4, %p757_p3 }
  0x18   : > { %p752_p1 = pnand %p750_p0, %p740_p13 }
  0x1a   : > { %p753_p2 = pneg %p752_p1 }
  0x1c   : > { %p760_p8 = pnand %p759_p7, %p753_p2 }
  0x1e   : > { %763 = shalt.err (!%p760_p8)
}
  0x1f   : > { %s892_s8 = smov 128   ;;  %s893_s9 = smov 8  }
  0x20   : > { %672 = dma.hbm_to_vmem [thread:$0]  (!%p984_p12), %s1125_s0, 256, %s156_s29, [#allocation3], %s892_s8, %s892_s8, %s893_s9  }
  0x21   : > { %s775_s12 = scalar_lea.vmem %s170_s6, 128  ;;  %p783_p9 = scmp.lt.s32.totalorder %s170_s6, %s170_s6 }
  0x22   : > { %p776_p11 = scmp.ne.s32.totalorder %s170_s6, %s775_s12  ;;  %p784_p6 = scmp.lt.s32.totalorder %s775_s12, %s775_s12 }
  0x24   : > { %p778_p0 = pnand %p776_p11, %p740_p13  ;;  %p785_p3 = por %p784_p6, %p783_p9 }
  0x26   : > { %p779_p1 = pneg %p778_p0 }
  0x28   : > { %p786_p2 = pnand %p785_p3, %p779_p1 }
  0x2a   : > { %789 = shalt.err (!%p786_p2)
}
  0x2b   : > { %675 = dma.hbm_to_vmem [thread:$0]  (!%p984_p12), %s1126_s1, 128, %s170_s6, [#allocation6]  }
  0x2c   : > { %185 = sbr.rel (%p976_p10) target bundleno = 1070 (0x42e), region = 32  ;;  %p1135_p4 = scmp.eq.s32.totalorder (!%p976_p10), %s948_s19, 0 }
  0x31   : > { %859 = dma.done.wait (%p1135_p4), [#allocation3], 256   ;;  %p1136_p13 = pmov %p1135_p4 }
  0x32   : > { %p1137_p7 = pmov %p1135_p4 }
  0x33   : > { %861 = vsyncadd (%p1136_p13), [#allocation3], 4294967040 }
  0x34   : > { %863 = dma.done.wait (%p1137_p7), [#allocation6], 128   ;;  %p1138_p6 = pmov %p1135_p4 }
  0x35   : > { %v894_v0 = vmov 0.0   ;;  %vm895_vm0 = vmmov 0   ;;  %s625_s20 = sshll.u32 %s948_s19, 3  ;;  %v217_v1 = vld [vmem:[#allocation2 + $0x8] sm:$0xff]  ;;  %v216_v2 = vld [vmem:[#allocation2] sm:$0xff]  ;;  %v330_v4 = vld [vmem:[#allocation5] sm:$0xff]  ;;  %v290_v7 = vlaneseq }
  0x36   : > { %865 = vsyncadd (%p1138_p6), [#allocation6], 4294967168  ;;  %639 = vmatprep.subr.mxu0 %v894_v0  ;;  %643 = vmatprep.mubr.msk.f32.mxu0 %vm895_vm0, %v894_v0  ;;  %s218_s22 = scalar_lea.vmem [#allocation2], %s625_s20  ;;  %s896_s23 = smov 127   ;;  %v294_v9 = vstv %s625_s20  ;;  %vm309_vm4 = vcmask 121856   ;;  %vm315_vm7 = vcmask 130048   ;;  %v326_v23 = vmul.f32 %v330_v4, %v330_v4 }
  0x37   : > { %646 = vmatprep.subr.mxu1 %v894_v0  ;;  %648 = vmatprep.mubr.msk.f32.mxu1 %vm895_vm0, %v894_v0  ;;  %v219_v3 = vld [vmem:[%s218_s22] sm:$0xff]  ;;  %s897_s27 = smov 15   ;;  %v293_v8 = vshrl.u32 %v290_v7, 7  ;;  %v291_v11 = vand.u32 127, %v290_v7  ;;  %s898_s30 = smov 120   ;;  %vm438_vm8 = vcmask 64512  }
  0x38   : > { %640 = vmatpush3.xpose.msra.mxu0 %v217_v1  ;;  %647 = vmatpush3.xpose.msra.mxu1 %v330_v4  ;;  %v627_v29 = vld [vmem:[%s1127_s2] ss:$0 sm:$0xff]  ;;  %s899_s5 = smov 7   ;;  %vm424_vm9 = vcmask 56320   ;;  %s1041_s6 = sand.u32 1, %s880_s16  }
  0x39   : > { %641 = vmatprep.subr.mxu0 %v894_v0  ;;  %v295_v10 = vadd.s32 %v294_v9, %v293_v8  ;;  %vm296_vm1 = vcmp.lt.s32.totalorder %v291_v11, 15  ;;  %s623_s7 = sshll.u32 %s1041_s6, 3  ;;  %s630_s9 = sshll.u32 %s948_s19, 7 }
  0x3a   : > { %s207_s11 = scalar_lea.vmem [#allocation7], %s623_s7  ;;  %s1045_s14 = scalar_lea.vmem [#allocation8], %s623_s7 }
  0x3b   : > { %649 = vmatmul.mubr.f32.vlgmr.msra.gmra.mxu1 %v330_v4  ;;  %v626_v12 = vadd.s32 4294967294, %v295_v10  ;;  %vm297_vm2 = vcmp.lt.s32.totalorder %v291_v11, %v295_v10  ;;  %s500_s12 = sshll.u32 %s207_s11, 4  ;;  %s513_s20 = sshll.u32 %s1045_s14, 4  ;;  %s1053_s12 = int_to_ptr.vmem [resolvable:$true] %s500_s12  ;;  %s1063_s20 = int_to_ptr.vmem [resolvable:$true] %s513_s20 }
  0x3c   : > { %642 = vmatpush3.xpose.msra.mxu0 %v216_v2  ;;  %vm1018_vm5 = vmand %vm297_vm2, %vm296_vm1  ;;  %s482_s7 = scalar_lea.sflag [#allocation4], %s1041_s6 }
  0x3d   : > { %vm300_vm3 = vcmp.ge.s32.totalorder %v291_v11, %v626_v12 }
  0x3e   : > { %vm1022_vm6 = vmand %vm300_vm3, %vm296_vm1 }
  0x3f   : > { %644 = vmatmul.mubr.f32.vlgmr.msra.gmra.mxu0 %v219_v3 }
  0xfb   : > { %v397_v24 = vpop.f32.mrf.mxu1 }
  0xfc   : > { %v408_v30 = vmul.f32 2.0, %v397_v24 }
  0xfd   : > { %v650_v25 = vpop.f32.mrf.mxu1 }
  0xff   : > { %v286_v5 = vpop.f32.mrf.mxu0 }
 0x100   : > { %303 = vrot.lane.b32.xlu0 %v286_v5, %s896_s23  ;;  %v311_v19 = vsel %vm1018_vm5, %v286_v5, 0.0 }
 0x101   : > { %v645_v6 = vpop.f32.mrf.mxu0 }
 0x104   : > { %306 = vrot.lane.b32.xlu0 %v286_v5, %s897_s27  ;;  %s1051_s27 = scalar_lea.hbm %s1128_s3, %s630_s9 }
 0x172   : > { %v304_v13 = vpop.permute.xlu0 %303 }
 0x176   : > { %v307_v16 = vpop.permute.xlu0 %306 }
 0x177   : > { %v310_v17 = vsel %vm309_vm4, %v304_v13, %v307_v16 }
 0x178   : > { %v312_v18 = vsel %vm1022_vm6, %v310_v17, 0.0 }
 0x179   : > { %v313_v20 = vadd.f32 %v312_v18, %v311_v19 }
 0x17b   : > { %v314_v21 = vsel %vm296_vm1, %v313_v20, -inf }
 0x17c   : > { %v316_v22 = vsel %vm315_vm7, %v314_v21, -inf }
 0x17d   : > { %317 = vmax.xlane.f32.xlu1 %v316_v22 }
 0x181   : > { %327 = vadd.xlane.f32.xlu1 %v326_v23 }
 0x206   : > { %v318_v26 = vpop.xlane.xlu1 %317 }
 0x207   : > { %v319_v27 = vsub.f32 %v314_v21, %v318_v26 }
 0x209   : > { %v320_v28 = vmul.f32 1.442695, %v319_v27 }
 0x20a   : > { %v328_v31 = vpop.xlane.xlu1 %327 }
 0x20b   : > { %730 = vpow2.f32 %v320_v28  ;;  %v407_v32 = vadd.f32 %v627_v29, %v328_v31 }
 0x20d   : > { %v409_v33 = vsub.f32 %v407_v32, %v408_v30 }
 0x20f   : > { %v412_v34 = vmul.f32 1.442695, %v409_v33 }
 0x211   : > { %732 = vpow2.f32 %v412_v34 }
 0x218   : > { %v731_v35 = vpop.eup %730 }
 0x219   : > { %v322_v36 = vsel %vm315_vm7, %v731_v35, 0.0 }
 0x21a   : > { %323 = vadd.xlane.f32.xlu0 %v322_v36 }
 0x21e   : > { %v733_v37 = vpop.eup %732 }
 0x21f   : > { %v414_v38 = vadd.f32 1.0, %v733_v37 }
 0x221   : > { %734 = vrcp.f32 %v414_v38 }
 0x22e   : > { %v735_v39 = vpop.eup %734 }
 0x22f   : > { %418 = vrot.lane.b32.xlu1 %v735_v39, %s896_s23  ;;  %v466_v58 = vsel %vm438_vm8, %v735_v39, 0.0 }
 0x2a1   : > { %v419_v47 = vpop.permute.xlu1 %418 }
 0x2a3   : > { %v324_v40 = vpop.xlane.xlu0 %323 }
 0x2a4   : > { %736 = vlog2.f32 %v324_v40 }
 0x2b1   : > { %v737_v41 = vpop.eup %736 }
 0x2b2   : > { %v427_v42 = vmul.f32 0.6931472, %v737_v41 }
 0x2b4   : > { %v428_v43 = vadd.f32 %v427_v42, %v318_v26 }
 0x2b6   : > { %v429_v44 = vsub.f32 %v428_v43, %v313_v20 }
 0x2b8   : > { %v430_v45 = vsel %vm1018_vm5, %v429_v44, 0.0  ;;  %v431_v46 = vsel %vm1022_vm6, %v429_v44, 0.0 }
 0x2b9   : > { %433 = vrot.lane.b32.xlu1 %v430_v45, %s898_s30 }
 0x2bd   : > { %450 = vrot.lane.b32.xlu1 %v431_v46, %s898_s30  ;;  %s1060_s30 = scalar_lea.hbm %s1129_s4, %s630_s9 }
 0x2c1   : > { %421 = vrot.lane.b32.xlu1 %v735_v39, %s899_s5 }
 0x32b   : > { %v434_v48 = vpop.permute.xlu1 %433 }
 0x32c   : > { %v436_v49 = vadd.f32 %v434_v48, %v430_v45 }
 0x32e   : > { %v437_v50 = vmul.f32 %v735_v39, %v436_v49 }
 0x32f   : > { %v451_v51 = vpop.permute.xlu1 %450 }
 0x330   : > { %v439_v52 = vsel %vm438_vm8, %v437_v50, 0.0  ;;  %v453_v53 = vadd.f32 %v451_v51, %v431_v46 }
 0x331   : > { %440 = vadd.xlane.f32.xlu1 %v439_v52 }
 0x333   : > { %v422_v54 = vpop.permute.xlu1 %421 }
 0x334   : > { %v425_v55 = vsel %vm424_vm9, %v419_v47, %v422_v54 }
 0x335   : > { %v454_v56 = vmul.f32 %v453_v53, %v425_v55 }
 0x337   : > { %v455_v57 = vsel %vm438_vm8, %v454_v56, 0.0 }
 0x338   : > { %456 = vadd.xlane.f32.xlu0 %v455_v57 }
 0x33c   : > { %467 = vadd.xlane.f32.xlu0 %v466_v58 }
 0x3ba   : > { %v441_v59 = vpop.xlane.xlu1 %440 }
 0x3bb   : > { %v442_v60 = vrot.slane %v441_v59, 4 }
 0x3bd   : > { %v443_v61 = vadd.f32 %v442_v60, %v441_v59 }
 0x3bf   : > { %v444_v62 = vrot.slane %v443_v61, 2 }
 0x3c1   : > { %v457_v63 = vpop.xlane.xlu0 %456  ;;  %v445_v0 = vadd.f32 %v444_v62, %v443_v61 }
 0x3c2   : > { %v458_v1 = vrot.slane %v457_v63, 4 }
 0x3c3   : > { %v446_v2 = vrot.slane %v445_v0, 1 }
 0x3c4   : > { %v459_v3 = vadd.f32 %v458_v1, %v457_v63 }
 0x3c5   : > { %v468_v4 = vpop.xlane.xlu0 %467  ;;  %v447_v5 = vadd.f32 %v446_v2, %v445_v0 }
 0x3c6   : > { %v460_v6 = vrot.slane %v459_v3, 2  ;;  %v469_v7 = vrot.slane %v468_v4, 4 }
 0x3c7   : > { %651 = vpush %v447_v5 }
 0x3c8   : > { %v470_v8 = vadd.f32 %v469_v7, %v468_v4  ;;  %v461_v9 = vadd.f32 %v460_v6, %v459_v3 }
 0x3ca   : > { %v471_v10 = vrot.slane %v470_v8, 2  ;;  %v462_v11 = vrot.slane %v461_v9, 1 }
 0x3cc   : > { %v472_v12 = vadd.f32 %v471_v10, %v470_v8  ;;  %v463_v13 = vadd.f32 %v462_v11, %v461_v9 }
 0x3ce   : > { %653 = vpush %v463_v13  ;;  %v473_v14 = vrot.slane %v472_v12, 1 }
 0x3d0   : > { %v474_v15 = vadd.f32 %v473_v14, %v472_v12 }
 0x3d2   : > { %655 = vpush %v474_v15 }
 0x3f8   : > { %s652_s8 = spop %651 }
 0x3ff   : > { %s654_s10 = spop %653 }
 0x400   : > { %s465_s13 = sadd.f32 %s654_s10, %s652_s8  ;;  %s790_s8 = scalar_lea.vmem %s1053_s12, 128 }
 0x401   : > { %p791_p9 = scmp.ne.s32.totalorder %s1053_s12, %s790_s8  ;;  %s900_s10 = smov [#allocation7]  }
 0x402   : > { %v477_v16 = vstv %s465_s13  ;;  %s794_s13 = sshll.u32 %s900_s10, 4  ;;  %s795_s13 = int_to_ptr.vmem [resolvable:$false] %s794_s13 }
 0x403   : > { %478 = vst [vmem:[%s207_s11] sm:$0xff] %v477_v16  ;;  %s1055_s19 = spop %655  ;;  %p792_p10 = pnand %p791_p9, %p965_p5 }
 0x404   : > { %s476_s5 = smul.f32 2.0, %s1055_s19  ;;  %s796_s11 = scalar_lea.vmem %s795_s13, 256 }
 0x405   : > { %p793_p12 = pneg %p792_p10  ;;  %p797_p8 = scmp.lt.s32.totalorder %s1053_s12, %s795_s13 }
 0x406   : > { %p798_p11 = scmp.lt.s32.totalorder %s796_s11, %s790_s8 }
 0x408   : > { %p799_p0 = por %p798_p11, %p797_p8 }
 0x40a   : > { %p800_p1 = pnand %p799_p0, %p793_p12 }
 0x40c   : > { %803 = shalt.err (!%p800_p1)
}
 0x40d   : > { %s804_s9 = scalar_lea.hbm %s1051_s27, 128  ;;  %s808_s19 = scalar_lea.hbm %s1128_s3, 256 }
 0x40e   : > { %p805_p3 = scmp.ne.s32.totalorder %s1051_s27, %s804_s9  ;;  %p809_p13 = scmp.lt.s32.totalorder %s1051_s27, %s1128_s3 }
 0x40f   : > { %p810_p7 = scmp.lt.s32.totalorder %s808_s19, %s804_s9 }
 0x410   : > { %p806_p2 = pnand %p805_p3, %p965_p5 }
 0x411   : > { %p811_p6 = por %p810_p7, %p809_p13 }
 0x412   : > { %p807_p4 = pneg %p806_p2 }
 0x414   : > { %p812_p9 = pnand %p811_p6, %p807_p4 }
 0x416   : > { %815 = shalt.err (!%p812_p9)
}
 0x417   : > { %665 = dma.vmem_to_hbm [thread:$0]  (%p965_p5), %s1053_s12, 128, %s1051_s27, %s482_s7   ;;  %v479_v17 = vstv %s476_s5 }
 0x418   : > { %480 = vst [vmem:[%s1045_s14] sm:$0xff] %v479_v17  ;;  %s487_s8 = scalar_lea.sflag [#allocation9], %s1041_s6  ;;  %s816_s10 = scalar_lea.vmem %s1063_s20, 128 }
 0x419   : > { %p817_p10 = scmp.ne.s32.totalorder %s1063_s20, %s816_s10  ;;  %s901_s13 = smov [#allocation8]  }
 0x41a   : > { %s820_s11 = sshll.u32 %s901_s13, 4  ;;  %s821_s11 = int_to_ptr.vmem [resolvable:$false] %s820_s11 }
 0x41b   : > { %p818_p12 = pnand %p817_p10, %p965_p5  ;;  %s822_s9 = scalar_lea.vmem %s821_s11, 256 }
 0x41c   : > { %p823_p11 = scmp.lt.s32.totalorder %s1063_s20, %s821_s11  ;;  %p824_p0 = scmp.lt.s32.totalorder %s822_s9, %s816_s10 }
 0x41d   : > { %p819_p8 = pneg %p818_p12 }
 0x41e   : > { %p825_p1 = por %p824_p0, %p823_p11 }
 0x420   : > { %p826_p3 = pnand %p825_p1, %p819_p8 }
 0x422   : > { %829 = shalt.err (!%p826_p3)
}
 0x423   : > { %s830_s12 = scalar_lea.hbm %s1060_s30, 128  ;;  %s834_s27 = scalar_lea.hbm %s1129_s4, 256 }
 0x424   : > { %p831_p2 = scmp.ne.s32.totalorder %s1060_s30, %s830_s12  ;;  %p835_p7 = scmp.lt.s32.totalorder %s1060_s30, %s1129_s4 }
 0x425   : > { %p836_p6 = scmp.lt.s32.totalorder %s834_s27, %s830_s12 }
 0x426   : > { %p832_p4 = pnand %p831_p2, %p965_p5 }
 0x427   : > { %p837_p9 = por %p836_p6, %p835_p7 }
 0x428   : > { %p833_p13 = pneg %p832_p4 }
 0x42a   : > { %p838_p10 = pnand %p837_p9, %p833_p13 }
 0x42c   : > { %841 = shalt.err (!%p838_p10)
}
 0x42d   : > { %666 = dma.vmem_to_hbm [thread:$0]  (%p965_p5), %s1063_s20, 128, %s1060_s30, %s487_s8  }
 0x42e PF: > { %p687_p12 = scmp.ge.s32.totalorder %s888_s18, 2  ;;  %s525_s22 = sand.u32 1, %s876_s15  }
 0x42f   : > { %p1143_p8 = scmp.ne.s32.totalorder %s1132_s26, 0  ;;  %s526_s23 = scalar_lea.sflag [#allocation4], %s525_s22 }
 0x431   : > { %p677_p11 = pnand %p687_p12, %p1143_p8 }
 0x433   : > { %p678_p0 = pneg %p677_p11 }
 0x435   : > { %867 = dma.done.wait (%p678_p0), %s526_s23, 128  }
 0x436   : > { %869 = vsyncadd (%p678_p0), %s526_s23, 4294967168  ;;  %s535_s19 = scalar_lea.sflag [#allocation9], %s525_s22 }
 0x437   : > { %871 = dma.done.wait (%p678_p0), %s535_s19, 128  }
 0x438   : > { %873 = vsyncadd (%p678_p0), %s535_s19, 4294967168  ;;  %p20_p5 = scmp.ge.s32.totalorder %s952_s21, 4   ;;  %s1144_s15 = smov %s880_s16 }
 0x439   : > { %s1145_s16 = smov %s884_s17  ;;  %s1146_s17 = smov %s963_s24 }
 0x43a   : > { %s1147_s18 = smov %s952_s21  ;;  %22 = sbr.rel (!%p20_p5) target bundleno = 7 (0x7), region = 91 }
 0x43f   :  { %540 = vsyncpa [#allocation3], 1 }
 0x440   :  { %542 = vsyncpa [#allocation3 + $0x1], 1 }
 0x441   :  { %543 = vsyncpa [#allocation6], 1 }
 0x442   :  { %544 = vsyncpa [#allocation4], 1 }
 0x443   :  { %546 = vsyncpa [#allocation4 + $0x1], 1 }
 0x444   :  { %547 = vsyncpa [#allocation9], 1 }
 0x445   :  { %549 = vsyncpa [#allocation9 + $0x1], 1 }

</bundles_post_ra>
